<compile_context>
chip_gen: v7x
topology: tpu7x:2x2x1
jax: 0.10.0
libtpu: 0.0.40
codegen_flags: <defaults>
</compile_context>

<pallas_src>
import functools
import math

import jax
import jax.numpy as jnp
from jax.experimental import pallas as pl
from jax.experimental.pallas import tpu as pltpu

BN_EPS = 1e-5
LANE = 128  # vreg lane width; all feature dims are padded to this


def _round_up(x, m):
    return ((x + m - 1) // m) * m


# ----------------------------------------------------------------------------------
# Kernel 1: layers 1-3 + BatchNorm statistics (masked partial sums across batch tiles)
# ----------------------------------------------------------------------------------
def _fwd_stats_kernel(
    n_ref,                      # SMEM (1,) int32: true (unpadded) batch size
    x_ref,                      # (TILE_B, LANE) input tile
    w1_ref, b1_ref,
    w2_ref, b2_ref,
    w3_ref, b3_ref,
    z3_ref,                     # out: (TILE_B, LANE) pre-BN activations
    stats_ref,                  # out: (2, LANE)  [mean; inv_std], grid-resident
    sum_ref, sumsq_ref,         # VMEM scratch (1, LANE) each, persist across grid steps
):
    i = pl.program_id(0)
    tile_b = x_ref.shape[0]

    @pl.when(i == 0)
    def _():
        sum_ref[...] = jnp.zeros_like(sum_ref)
        sumsq_ref[...] = jnp.zeros_like(sumsq_ref)

    x = x_ref[...]
    h1 = jnp.maximum(
        jnp.dot(x, w1_ref[...], preferred_element_type=jnp.float32) + b1_ref[...], 0.0)
    h2 = jnp.maximum(
        jnp.dot(h1, w2_ref[...], preferred_element_type=jnp.float32) + b2_ref[...], 0.0)
    z3 = jnp.dot(h2, w3_ref[...], preferred_element_type=jnp.float32) + b3_ref[...]
    z3_ref[...] = z3

    # Mask rows beyond the true batch so padding does not pollute the batch statistics.
    n_valid = n_ref[0]
    row = i * tile_b + jax.lax.broadcasted_iota(jnp.int32, z3.shape, 0)
    mask = (row < n_valid).astype(jnp.float32)
    zv = z3 * mask
    sum_ref[...] += jnp.sum(zv, axis=0, keepdims=True)
    sumsq_ref[...] += jnp.sum(zv * zv, axis=0, keepdims=True)

    @pl.when(i == pl.num_programs(0) - 1)
    def _():
        n_f = n_valid.astype(jnp.float32)
        mean = sum_ref[...] / n_f
        var = sumsq_ref[...] / n_f - mean * mean          # biased variance (PyTorch train mode)
        var = jnp.maximum(var, 0.0)                        # guard tiny negative from cancellation
        inv_std = jax.lax.rsqrt(var + BN_EPS)
        stats_ref[0:1, :] = mean
        stats_ref[1:2, :] = inv_std


# ----------------------------------------------------------------------------------
# Kernel 2: BatchNorm (with global stats) + ReLU + layer 4 + tanh
# ----------------------------------------------------------------------------------
def _bn_head_kernel(z3_ref, stats_ref, gamma_ref, beta_ref, w4_ref, b4_ref, out_ref):
    z3 = z3_ref[...]
    mean = stats_ref[0:1, :]
    inv_std = stats_ref[1:2, :]
    h3 = jnp.maximum((z3 - mean) * inv_std * gamma_ref[...] + beta_ref[...], 0.0)
    y = jnp.dot(h3, w4_ref[...], preferred_element_type=jnp.float32) + b4_ref[...]
    out_ref[...] = jnp.tanh(y)


# ----------------------------------------------------------------------------------
# Parameter handling
# ----------------------------------------------------------------------------------
def init_params(key, input_size, hidden_size, output_size):
    """Deterministic PyTorch-style init: U(-1/sqrt(fan_in), 1/sqrt(fan_in))."""
    dims = [input_size, hidden_size[0], hidden_size[1], hidden_size[2], output_size]
    params = {}
    keys = jax.random.split(key, 8)
    for i in range(4):
        fan_in = dims[i]
        bound = 1.0 / math.sqrt(fan_in)
        params[f"w{i + 1}"] = jax.random.uniform(
            keys[2 * i], (dims[i], dims[i + 1]), minval=-bound, maxval=bound, dtype=jnp.float32)
        params[f"b{i + 1}"] = jax.random.uniform(
            keys[2 * i + 1], (1, dims[i + 1]), minval=-bound, maxval=bound, dtype=jnp.float32)
    params["gamma"] = jnp.ones((1, hidden_size[2]), dtype=jnp.float32)
    params["beta"] = jnp.zeros((1, hidden_size[2]), dtype=jnp.float32)
    return params


def _pad_params(params):
    """Zero-pad every weight/bias to 128 lanes so all matmuls are lane-dense."""
    def pad_mat(w):
        return jnp.zeros((LANE, LANE), jnp.float32).at[: w.shape[0], : w.shape[1]].set(w)

    def pad_row(v, fill=0.0):
        return jnp.full((1, LANE), fill, jnp.float32).at[:, : v.shape[1]].set(v)

    return {
        "w1": pad_mat(params["w1"]), "b1": pad_row(params["b1"]),
        "w2": pad_mat(params["w2"]), "b2": pad_row(params["b2"]),
        "w3": pad_mat(params["w3"]), "b3": pad_row(params["b3"]),
        "w4": pad_mat(params["w4"]), "b4": pad_row(params["b4"]),
        "gamma": pad_row(params["gamma"], fill=1.0),
        "beta": pad_row(params["beta"]),
    }


# ----------------------------------------------------------------------------------
# Forward wrapper
# ----------------------------------------------------------------------------------
@functools.partial(jax.jit, static_argnames=("tile_b",))
def actor_nn_forward(x, params, *, tile_b=None):
    """x: (B, input_size) f32.  params: dict from init_params (unpadded shapes)."""
    B, in_size = x.shape
    out_size = params["w4"].shape[1]

    if tile_b is None:
        # Big enough to amortize per-step overhead; small shapes collapse to one tile.
        tile_b = min(512, _round_up(max(B, 8), 8))
    tile_b = max(8, _round_up(int(tile_b), 8))
    B_pad = _round_up(B, tile_b)
    num_tiles = B_pad // tile_b

    xp = jnp.zeros((B_pad, LANE), jnp.float32).at[:B, :in_size].set(x.astype(jnp.float32))
    p = _pad_params(params)
    n_valid = jnp.array([B], dtype=jnp.int32)

    w_spec = pl.BlockSpec((LANE, LANE), lambda i: (0, 0))       # VMEM-resident weights
    b_spec = pl.BlockSpec((1, LANE), lambda i: (0, 0))          # VMEM-resident bias rows
    row_spec = pl.BlockSpec((tile_b, LANE), lambda i: (i, 0))   # batch-tiled activations
    stats_spec = pl.BlockSpec((2, LANE), lambda i: (0, 0))      # grid-resident stats
    smem_spec = pl.BlockSpec(memory_space=pltpu.MemorySpace.SMEM)

    ce1 = pl.CostEstimate(
        flops=2 * B_pad * LANE * LANE * 3,
        transcendentals=LANE,
        bytes_accessed=4 * (2 * B_pad * LANE + 3 * LANE * LANE + 5 * LANE) + 4,
    )
    ce2 = pl.CostEstimate(
        flops=2 * B_pad * LANE * LANE + 8 * B_pad * LANE,
        transcendentals=B_pad * LANE,
        bytes_accessed=4 * (2 * B_pad * LANE + LANE * LANE + 5 * LANE),
    )

    # Pass 1: layers 1-3 + global BN statistics (accumulated across batch tiles).
    z3, stats = pl.pallas_call(
        _fwd_stats_kernel,
        grid=(num_tiles,),
        in_specs=[smem_spec, row_spec,
                  w_spec, b_spec, w_spec, b_spec, w_spec, b_spec],
        out_specs=[row_spec, stats_spec],
        out_shape=[jax.ShapeDtypeStruct((B_pad, LANE), jnp.float32),
                   jax.ShapeDtypeStruct((2, LANE), jnp.float32)],
        scratch_shapes=[pltpu.VMEM((1, LANE), jnp.float32),
                        pltpu.VMEM((1, LANE), jnp.float32)],
        compiler_params=pltpu.CompilerParams(dimension_semantics=("arbitrary",)),
        cost_estimate=ce1,
    )(n_valid, xp, p["w1"], p["b1"], p["w2"], p["b2"], p["w3"], p["b3"])

    # Pass 2: BatchNorm + ReLU + layer 4 + tanh; batch tiles are independent ("parallel",
    # so v7x can shard them across its two TensorCores).
    y = pl.pallas_call(
        _bn_head_kernel,
        grid=(num_tiles,),
        in_specs=[row_spec, stats_spec, b_spec, b_spec, w_spec, b_spec],
        out_specs=row_spec,
        out_shape=jax.ShapeDtypeStruct((B_pad, LANE), jnp.float32),
        compiler_params=pltpu.CompilerParams(dimension_semantics=("parallel",)),
        cost_estimate=ce2,
    )(z3, stats, p["gamma"], p["beta"], p["w4"], p["b4"])

    return y[:B, :out_size]


# ----------------------------------------------------------------------------------
# Pure-JAX reference (mirrors the PyTorch forward in training mode)
# ----------------------------------------------------------------------------------
def actor_nn_reference(x, params):
    h1 = jnp.maximum(x @ params["w1"] + params["b1"], 0.0)
    h2 = jnp.maximum(h1 @ params["w2"] + params["b2"], 0.0)
    z3 = h2 @ params["w3"] + params["b3"]
    mean = jnp.mean(z3, axis=0, keepdims=True)
    var = jnp.mean((z3 - mean) ** 2, axis=0, keepdims=True)
    bn = (z3 - mean) / jnp.sqrt(var + BN_EPS) * params["gamma"] + params["beta"]
    h3 = jnp.maximum(bn, 0.0)
    return jnp.tanh(h3 @ params["w4"] + params["b4"])


if __name__ == "__main__":
    key = jax.random.PRNGKey(0)
    k_params, k_x1, k_x2 = jax.random.split(key, 3)

    input_size = 16
    hidden_size = (32, 64, 32)
    output_size = 8
    params = init_params(k_params, input_size, hidden_size, output_size)

    # Case 1: small batch, single grid tile.
    x1 = jax.random.normal(k_x1, (8, input_size), dtype=jnp.float32)
    out1 = jax.block_until_ready(actor_nn_forward(x1, params))
    ref1 = actor_nn_reference(x1, params)
    assert out1.shape == (8, output_size)
    assert jnp.allclose(out1, ref1, atol=1e-4, rtol=1e-4), "mismatch vs reference (case 1)"

    # Case 2: batch not a multiple of the tile -> multi-tile grid + masked BN statistics.
    x2 = jax.random.normal(k_x2, (20, input_size), dtype=jnp.float32)
    out2 = jax.block_until_ready(actor_nn_forward(x2, params, tile_b=8))
    ref2 = actor_nn_reference(x2, params)
    assert out2.shape == (20, output_size)
    assert jnp.allclose(out2, ref2, atol=1e-4, rtol=1e-4), "mismatch vs reference (case 2)"

    print("KERNEL_OK")
</pallas_src>

<mosaic_0001>
module attributes {stable_mosaic.version = 11 : i64} {
  func.func @_fwd_stats_kernel(%arg0: i32, %arg1: memref<1xi32, #tpu.memory_space<smem>>, %arg2: memref<8x128xf32, #tpu.memory_space<vmem>>, %arg3: memref<128x128xf32, #tpu.memory_space<vmem>>, %arg4: memref<1x128xf32, #tpu.memory_space<vmem>>, %arg5: memref<128x128xf32, #tpu.memory_space<vmem>>, %arg6: memref<1x128xf32, #tpu.memory_space<vmem>>, %arg7: memref<128x128xf32, #tpu.memory_space<vmem>>, %arg8: memref<1x128xf32, #tpu.memory_space<vmem>>, %arg9: memref<8x128xf32, #tpu.memory_space<vmem>>, %arg10: memref<2x128xf32, #tpu.memory_space<vmem>>, %arg11: memref<1x128xf32, #tpu.memory_space<vmem>>, %arg12: memref<1x128xf32, #tpu.memory_space<vmem>>) attributes {dimension_semantics = [#tpu.dimension_semantics<arbitrary>], iteration_bounds = array<i64: 1>, scalar_prefetch = 0 : i64, scratch_operands = 2 : i64, tpu.core_type = #tpu.core_type<tc>, window_params = [{transform_indices = @transform_0, window_bounds = array<i64: 1>}, {transform_indices = @transform_1, window_bounds = array<i64: 8, 128>}, {pipeline_mode = #tpu.pipeline_mode<synchronous>, transform_indices = @transform_2, window_bounds = array<i64: 128, 128>}, {pipeline_mode = #tpu.pipeline_mode<synchronous>, transform_indices = @transform_3, window_bounds = array<i64: 1, 128>}, {pipeline_mode = #tpu.pipeline_mode<synchronous>, transform_indices = @transform_4, window_bounds = array<i64: 128, 128>}, {pipeline_mode = #tpu.pipeline_mode<synchronous>, transform_indices = @transform_5, window_bounds = array<i64: 1, 128>}, {pipeline_mode = #tpu.pipeline_mode<synchronous>, transform_indices = @transform_6, window_bounds = array<i64: 128, 128>}, {pipeline_mode = #tpu.pipeline_mode<synchronous>, transform_indices = @transform_7, window_bounds = array<i64: 1, 128>}, {transform_indices = @transform_8, window_bounds = array<i64: 8, 128>}, {pipeline_mode = #tpu.pipeline_mode<synchronous>, transform_indices = @transform_9, window_bounds = array<i64: 2, 128>}]} {
    %c0_i32 = arith.constant 0 : i32
    %0 = arith.cmpi eq, %arg0, %c0_i32 : i32
    %1 = arith.extui %0 : i1 to i32
    %c0_i32_0 = arith.constant 0 : i32
    %2 = arith.cmpi ne, %1, %c0_i32_0 : i32
    scf.if %2 {
      %cst_33 = arith.constant 0.000000e+00 : f32
      %48 = vector.broadcast %cst_33 : f32 to vector<1x128xf32>
      %c0_34 = arith.constant 0 : index
      %c0_35 = arith.constant 0 : index
      %49 = vector.load %arg11[%c0_34, %c0_35] : memref<1x128xf32, #tpu.memory_space<vmem>>, vector<1x128xf32>
      tpu.vector_store %arg11[%c0_34, %c0_35], %48 {strides = array<i32>} : memref<1x128xf32, #tpu.memory_space<vmem>>, vector<1x128xf32>,
      %cst_36 = arith.constant 0.000000e+00 : f32
      %50 = vector.broadcast %cst_36 : f32 to vector<1x128xf32>
      %c0_37 = arith.constant 0 : index
      %c0_38 = arith.constant 0 : index
      %51 = vector.load %arg12[%c0_37, %c0_38] : memref<1x128xf32, #tpu.memory_space<vmem>>, vector<1x128xf32>
      tpu.vector_store %arg12[%c0_37, %c0_38], %50 {strides = array<i32>} : memref<1x128xf32, #tpu.memory_space<vmem>>, vector<1x128xf32>,
    } else {
    }
    %c0 = arith.constant 0 : index
    %c0_1 = arith.constant 0 : index
    %3 = vector.load %arg2[%c0, %c0_1] : memref<8x128xf32, #tpu.memory_space<vmem>>, vector<8x128xf32>
    %c0_2 = arith.constant 0 : index
    %c0_3 = arith.constant 0 : index
    %4 = vector.load %arg3[%c0_2, %c0_3] : memref<128x128xf32, #tpu.memory_space<vmem>>, vector<128x128xf32>
    %cst = arith.constant dense<0.000000e+00> : vector<8x128xf32>
    %5 = tpu.matmul %3, %4, %cst {dimension_numbers = #tpu.dot_dimension_numbers<[1], [0], [0], [1], [0, 0, 1, 1], [], []>} : vector<8x128xf32>, vector<128x128xf32>, vector<8x128xf32> -> vector<8x128xf32>
    %c0_4 = arith.constant 0 : index
    %c0_5 = arith.constant 0 : index
    %6 = vector.load %arg4[%c0_4, %c0_5] : memref<1x128xf32, #tpu.memory_space<vmem>>, vector<1x128xf32>
    %7 = vector.broadcast %6 : vector<1x128xf32> to vector<8x128xf32>
    %8 = arith.addf %5, %7 : vector<8x128xf32>
    %cst_6 = arith.constant 0.000000e+00 : f32
    %9 = vector.broadcast %cst_6 : f32 to vector<8x128xf32>
    %10 = arith.maximumf %8, %9 : vector<8x128xf32>
    %c0_7 = arith.constant 0 : index
    %c0_8 = arith.constant 0 : index
    %11 = vector.load %arg5[%c0_7, %c0_8] : memref<128x128xf32, #tpu.memory_space<vmem>>, vector<128x128xf32>
    %cst_9 = arith.constant dense<0.000000e+00> : vector<8x128xf32>
    %12 = tpu.matmul %10, %11, %cst_9 {dimension_numbers = #tpu.dot_dimension_numbers<[1], [0], [0], [1], [0, 0, 1, 1], [], []>} : vector<8x128xf32>, vector<128x128xf32>, vector<8x128xf32> -> vector<8x128xf32>
    %c0_10 = arith.constant 0 : index
    %c0_11 = arith.constant 0 : index
    %13 = vector.load %arg6[%c0_10, %c0_11] : memref<1x128xf32, #tpu.memory_space<vmem>>, vector<1x128xf32>
    %14 = vector.broadcast %13 : vector<1x128xf32> to vector<8x128xf32>
    %15 = arith.addf %12, %14 : vector<8x128xf32>
    %cst_12 = arith.constant 0.000000e+00 : f32
    %16 = vector.broadcast %cst_12 : f32 to vector<8x128xf32>
    %17 = arith.maximumf %15, %16 : vector<8x128xf32>
    %c0_13 = arith.constant 0 : index
    %c0_14 = arith.constant 0 : index
    %18 = vector.load %arg7[%c0_13, %c0_14] : memref<128x128xf32, #tpu.memory_space<vmem>>, vector<128x128xf32>
    %cst_15 = arith.constant dense<0.000000e+00> : vector<8x128xf32>
    %19 = tpu.matmul %17, %18, %cst_15 {dimension_numbers = #tpu.dot_dimension_numbers<[1], [0], [0], [1], [0, 0, 1, 1], [], []>} : vector<8x128xf32>, vector<128x128xf32>, vector<8x128xf32> -> vector<8x128xf32>
    %c0_16 = arith.constant 0 : index
    %c0_17 = arith.constant 0 : index
    %20 = vector.load %arg8[%c0_16, %c0_17] : memref<1x128xf32, #tpu.memory_space<vmem>>, vector<1x128xf32>
    %21 = vector.broadcast %20 : vector<1x128xf32> to vector<8x128xf32>
    %22 = arith.addf %19, %21 : vector<8x128xf32>
    %c0_18 = arith.constant 0 : index
    %c0_19 = arith.constant 0 : index
    %23 = vector.load %arg9[%c0_18, %c0_19] : memref<8x128xf32, #tpu.memory_space<vmem>>, vector<8x128xf32>
    tpu.vector_store %arg9[%c0_18, %c0_19], %22 {strides = array<i32>} : memref<8x128xf32, #tpu.memory_space<vmem>>, vector<8x128xf32>,
    %c0_20 = arith.constant 0 : index
    %24 = memref.load %arg1[%c0_20] : memref<1xi32, #tpu.memory_space<smem>>
    %c8_i32 = arith.constant 8 : i32
    %25 = arith.muli %arg0, %c8_i32 : i32
    %26 = tpu.iota {dimensions = array<i32: 0>} : vector<8x128xi32>
    %27 = vector.broadcast %25 : i32 to vector<8x128xi32>
    %28 = arith.addi %27, %26 : vector<8x128xi32>
    %29 = vector.broadcast %24 : i32 to vector<8x128xi32>
    %30 = arith.cmpi slt, %28, %29 : vector<8x128xi32>
    %31 = arith.extui %30 : vector<8x128xi1> to vector<8x128xi32>
    %32 = arith.sitofp %31 : vector<8x128xi32> to vector<8x128xf32>
    %33 = arith.mulf %22, %32 : vector<8x128xf32>
    %c0_21 = arith.constant 0 : index
    %c0_22 = arith.constant 0 : index
    %34 = vector.load %arg11[%c0_21, %c0_22] : memref<1x128xf32, #tpu.memory_space<vmem>>, vector<1x128xf32>
    %cst_23 = arith.constant dense<0.000000e+00> : vector<128xf32>
    %35 = vector.multi_reduction <add>, %33, %cst_23 [0] : vector<8x128xf32> to vector<128xf32>
    %36 = vector.shape_cast %35 : vector<128xf32> to vector<1x128xf32>
    %37 = arith.addf %34, %36 : vector<1x128xf32>
    %c0_24 = arith.constant 0 : index
    %c0_25 = arith.constant 0 : index
    %38 = vector.load %arg11[%c0_24, %c0_25] : memref<1x128xf32, #tpu.memory_space<vmem>>, vector<1x128xf32>
    tpu.vector_store %arg11[%c0_24, %c0_25], %37 {strides = array<i32>} : memref<1x128xf32, #tpu.memory_space<vmem>>, vector<1x128xf32>,
    %c0_26 = arith.constant 0 : index
    %c0_27 = arith.constant 0 : index
    %39 = vector.load %arg12[%c0_26, %c0_27] : memref<1x128xf32, #tpu.memory_space<vmem>>, vector<1x128xf32>
    %40 = arith.mulf %33, %33 : vector<8x128xf32>
    %cst_28 = arith.constant dense<0.000000e+00> : vector<128xf32>
    %41 = vector.multi_reduction <add>, %40, %cst_28 [0] : vector<8x128xf32> to vector<128xf32>
    %42 = vector.shape_cast %41 : vector<128xf32> to vector<1x128xf32>
    %43 = arith.addf %39, %42 : vector<1x128xf32>
    %c0_29 = arith.constant 0 : index
    %c0_30 = arith.constant 0 : index
    %44 = vector.load %arg12[%c0_29, %c0_30] : memref<1x128xf32, #tpu.memory_space<vmem>>, vector<1x128xf32>
    tpu.vector_store %arg12[%c0_29, %c0_30], %43 {strides = array<i32>} : memref<1x128xf32, #tpu.memory_space<vmem>>, vector<1x128xf32>,
    %c0_i32_31 = arith.constant 0 : i32
    %45 = arith.cmpi eq, %arg0, %c0_i32_31 : i32
    %46 = arith.extui %45 : i1 to i32
    %c0_i32_32 = arith.constant 0 : i32
    %47 = arith.cmpi ne, %46, %c0_i32_32 : i32
    scf.if %47 {
      %48 = arith.sitofp %24 : i32 to f32
      %c0_33 = arith.constant 0 : index
      %c0_34 = arith.constant 0 : index
      %49 = vector.load %arg11[%c0_33, %c0_34] : memref<1x128xf32, #tpu.memory_space<vmem>>, vector<1x128xf32>
      %50 = vector.broadcast %48 : f32 to vector<1x128xf32>
      %51 = arith.divf %49, %50 : vector<1x128xf32>
      %c0_35 = arith.constant 0 : index
      %c0_36 = arith.constant 0 : index
      %52 = vector.load %arg12[%c0_35, %c0_36] : memref<1x128xf32, #tpu.memory_space<vmem>>, vector<1x128xf32>
      %53 = vector.broadcast %48 : f32 to vector<1x128xf32>
      %54 = arith.divf %52, %53 : vector<1x128xf32>
      %55 = arith.mulf %51, %51 : vector<1x128xf32>
      %56 = arith.subf %54, %55 : vector<1x128xf32>
      %cst_37 = arith.constant 0.000000e+00 : f32
      %57 = vector.broadcast %cst_37 : f32 to vector<1x128xf32>
      %58 = arith.maximumf %56, %57 : vector<1x128xf32>
      %cst_38 = arith.constant 9.99999974E-6 : f32
      %59 = vector.broadcast %cst_38 : f32 to vector<1x128xf32>
      %60 = arith.addf %58, %59 : vector<1x128xf32>
      %61 = math.rsqrt %60 : vector<1x128xf32>
      %c0_39 = arith.constant 0 : index
      %c0_40 = arith.constant 0 : index
      %62 = vector.load %arg10[%c0_39, %c0_40] : memref<2x128xf32, #tpu.memory_space<vmem>>, vector<1x128xf32>
      tpu.vector_store %arg10[%c0_39, %c0_40], %51 {strides = array<i32>} : memref<2x128xf32, #tpu.memory_space<vmem>>, vector<1x128xf32>,
      %c1 = arith.constant 1 : index
      %c0_41 = arith.constant 0 : index
      %63 = vector.load %arg10[%c1, %c0_41] : memref<2x128xf32, #tpu.memory_space<vmem>>, vector<1x128xf32>
      tpu.vector_store %arg10[%c1, %c0_41], %61 {strides = array<i32>} : memref<2x128xf32, #tpu.memory_space<vmem>>, vector<1x128xf32>,
    } else {
    }
    return
  }
  func.func @transform_0(%arg0: i32) -> i32 {
    %c0_i32 = arith.constant 0 : i32
    %c0_i32_0 = arith.constant 0 : i32
    return %c0_i32 : i32
  }
  func.func @transform_1(%arg0: i32) -> (i32, i32) {
    %c0_i32 = arith.constant 0 : i32
    %c0_i32_0 = arith.constant 0 : i32
    return %arg0, %c0_i32 : i32, i32
  }
  func.func @transform_2(%arg0: i32) -> (i32, i32) {
    %c0_i32 = arith.constant 0 : i32
    %c0_i32_0 = arith.constant 0 : i32
    %c0_i32_1 = arith.constant 0 : i32
    return %c0_i32, %c0_i32_0 : i32, i32
  }
  func.func @transform_3(%arg0: i32) -> (i32, i32) {
    %c0_i32 = arith.constant 0 : i32
    %c0_i32_0 = arith.constant 0 : i32
    %c0_i32_1 = arith.constant 0 : i32
    return %c0_i32, %c0_i32_0 : i32, i32
  }
  func.func @transform_4(%arg0: i32) -> (i32, i32) {
    %c0_i32 = arith.constant 0 : i32
    %c0_i32_0 = arith.constant 0 : i32
    %c0_i32_1 = arith.constant 0 : i32
    return %c0_i32, %c0_i32_0 : i32, i32
  }
  func.func @transform_5(%arg0: i32) -> (i32, i32) {
    %c0_i32 = arith.constant 0 : i32
    %c0_i32_0 = arith.constant 0 : i32
    %c0_i32_1 = arith.constant 0 : i32
    return %c0_i32, %c0_i32_0 : i32, i32
  }
  func.func @transform_6(%arg0: i32) -> (i32, i32) {
    %c0_i32 = arith.constant 0 : i32
    %c0_i32_0 = arith.constant 0 : i32
    %c0_i32_1 = arith.constant 0 : i32
    return %c0_i32, %c0_i32_0 : i32, i32
  }
  func.func @transform_7(%arg0: i32) -> (i32, i32) {
    %c0_i32 = arith.constant 0 : i32
    %c0_i32_0 = arith.constant 0 : i32
    %c0_i32_1 = arith.constant 0 : i32
    return %c0_i32, %c0_i32_0 : i32, i32
  }
  func.func @transform_8(%arg0: i32) -> (i32, i32) {
    %c0_i32 = arith.constant 0 : i32
    %c0_i32_0 = arith.constant 0 : i32
    return %arg0, %c0_i32 : i32, i32
  }
  func.func @transform_9(%arg0: i32) -> (i32, i32) {
    %c0_i32 = arith.constant 0 : i32
    %c0_i32_0 = arith.constant 0 : i32
    %c0_i32_1 = arith.constant 0 : i32
    return %c0_i32, %c0_i32_0 : i32, i32
  }
}

module attributes {stable_mosaic.version = 11 : i64} {
  func.func @_bn_head_kernel(%arg0: i32, %arg1: memref<8x128xf32, #tpu.memory_space<vmem>>, %arg2: memref<2x128xf32, #tpu.memory_space<vmem>>, %arg3: memref<1x128xf32, #tpu.memory_space<vmem>>, %arg4: memref<1x128xf32, #tpu.memory_space<vmem>>, %arg5: memref<128x128xf32, #tpu.memory_space<vmem>>, %arg6: memref<1x128xf32, #tpu.memory_space<vmem>>, %arg7: memref<8x128xf32, #tpu.memory_space<vmem>>) attributes {dimension_semantics = [#tpu.dimension_semantics<parallel>], iteration_bounds = array<i64: 1>, scalar_prefetch = 0 : i64, scratch_operands = 0 : i64, tpu.core_type = #tpu.core_type<tc>, window_params = [{transform_indices = @transform_0, window_bounds = array<i64: 8, 128>}, {pipeline_mode = #tpu.pipeline_mode<synchronous>, transform_indices = @transform_1, window_bounds = array<i64: 2, 128>}, {pipeline_mode = #tpu.pipeline_mode<synchronous>, transform_indices = @transform_2, window_bounds = array<i64: 1, 128>}, {pipeline_mode = #tpu.pipeline_mode<synchronous>, transform_indices = @transform_3, window_bounds = array<i64: 1, 128>}, {pipeline_mode = #tpu.pipeline_mode<synchronous>, transform_indices = @transform_4, window_bounds = array<i64: 128, 128>}, {pipeline_mode = #tpu.pipeline_mode<synchronous>, transform_indices = @transform_5, window_bounds = array<i64: 1, 128>}, {transform_indices = @transform_6, window_bounds = array<i64: 8, 128>}]} {
    %c0 = arith.constant 0 : index
    %c0_0 = arith.constant 0 : index
    %0 = vector.load %arg1[%c0, %c0_0] : memref<8x128xf32, #tpu.memory_space<vmem>>, vector<8x128xf32>
    %c0_1 = arith.constant 0 : index
    %c0_2 = arith.constant 0 : index
    %1 = vector.load %arg2[%c0_1, %c0_2] : memref<2x128xf32, #tpu.memory_space<vmem>>, vector<1x128xf32>
    %c1 = arith.constant 1 : index
    %c0_3 = arith.constant 0 : index
    %2 = vector.load %arg2[%c1, %c0_3] : memref<2x128xf32, #tpu.memory_space<vmem>>, vector<1x128xf32>
    %3 = vector.broadcast %1 : vector<1x128xf32> to vector<8x128xf32>
    %4 = arith.subf %0, %3 : vector<8x128xf32>
    %5 = vector.broadcast %2 : vector<1x128xf32> to vector<8x128xf32>
    %6 = arith.mulf %4, %5 : vector<8x128xf32>
    %c0_4 = arith.constant 0 : index
    %c0_5 = arith.constant 0 : index
    %7 = vector.load %arg3[%c0_4, %c0_5] : memref<1x128xf32, #tpu.memory_space<vmem>>, vector<1x128xf32>
    %8 = vector.broadcast %7 : vector<1x128xf32> to vector<8x128xf32>
    %9 = arith.mulf %6, %8 : vector<8x128xf32>
    %c0_6 = arith.constant 0 : index
    %c0_7 = arith.constant 0 : index
    %10 = vector.load %arg4[%c0_6, %c0_7] : memref<1x128xf32, #tpu.memory_space<vmem>>, vector<1x128xf32>
    %11 = vector.broadcast %10 : vector<1x128xf32> to vector<8x128xf32>
    %12 = arith.addf %9, %11 : vector<8x128xf32>
    %cst = arith.constant 0.000000e+00 : f32
    %13 = vector.broadcast %cst : f32 to vector<8x128xf32>
    %14 = arith.maximumf %12, %13 : vector<8x128xf32>
    %c0_8 = arith.constant 0 : index
    %c0_9 = arith.constant 0 : index
    %15 = vector.load %arg5[%c0_8, %c0_9] : memref<128x128xf32, #tpu.memory_space<vmem>>, vector<128x128xf32>
    %cst_10 = arith.constant dense<0.000000e+00> : vector<8x128xf32>
    %16 = tpu.matmul %14, %15, %cst_10 {dimension_numbers = #tpu.dot_dimension_numbers<[1], [0], [0], [1], [0, 0, 1, 1], [], []>} : vector<8x128xf32>, vector<128x128xf32>, vector<8x128xf32> -> vector<8x128xf32>
    %c0_11 = arith.constant 0 : index
    %c0_12 = arith.constant 0 : index
    %17 = vector.load %arg6[%c0_11, %c0_12] : memref<1x128xf32, #tpu.memory_space<vmem>>, vector<1x128xf32>
    %18 = vector.broadcast %17 : vector<1x128xf32> to vector<8x128xf32>
    %19 = arith.addf %16, %18 : vector<8x128xf32>
    %20 = math.tanh %19 : vector<8x128xf32>
    %c0_13 = arith.constant 0 : index
    %c0_14 = arith.constant 0 : index
    %21 = vector.load %arg7[%c0_13, %c0_14] : memref<8x128xf32, #tpu.memory_space<vmem>>, vector<8x128xf32>
    tpu.vector_store %arg7[%c0_13, %c0_14], %20 {strides = array<i32>} : memref<8x128xf32, #tpu.memory_space<vmem>>, vector<8x128xf32>,
    return
  }
  func.func @transform_0(%arg0: i32) -> (i32, i32) {
    %c0_i32 = arith.constant 0 : i32
    %c0_i32_0 = arith.constant 0 : i32
    return %arg0, %c0_i32 : i32, i32
  }
  func.func @transform_1(%arg0: i32) -> (i32, i32) {
    %c0_i32 = arith.constant 0 : i32
    %c0_i32_0 = arith.constant 0 : i32
    %c0_i32_1 = arith.constant 0 : i32
    return %c0_i32, %c0_i32_0 : i32, i32
  }
  func.func @transform_2(%arg0: i32) -> (i32, i32) {
    %c0_i32 = arith.constant 0 : i32
    %c0_i32_0 = arith.constant 0 : i32
    %c0_i32_1 = arith.constant 0 : i32
    return %c0_i32, %c0_i32_0 : i32, i32
  }
  func.func @transform_3(%arg0: i32) -> (i32, i32) {
    %c0_i32 = arith.constant 0 : i32
    %c0_i32_0 = arith.constant 0 : i32
    %c0_i32_1 = arith.constant 0 : i32
    return %c0_i32, %c0_i32_0 : i32, i32
  }
  func.func @transform_4(%arg0: i32) -> (i32, i32) {
    %c0_i32 = arith.constant 0 : i32
    %c0_i32_0 = arith.constant 0 : i32
    %c0_i32_1 = arith.constant 0 : i32
    return %c0_i32, %c0_i32_0 : i32, i32
  }
  func.func @transform_5(%arg0: i32) -> (i32, i32) {
    %c0_i32 = arith.constant 0 : i32
    %c0_i32_0 = arith.constant 0 : i32
    %c0_i32_1 = arith.constant 0 : i32
    return %c0_i32, %c0_i32_0 : i32, i32
  }
  func.func @transform_6(%arg0: i32) -> (i32, i32) {
    %c0_i32 = arith.constant 0 : i32
    %c0_i32_0 = arith.constant 0 : i32
    return %arg0, %c0_i32 : i32, i32
  }
}

</mosaic_0001>

<bundles_post_ra>
// kernel: actor_nn_forward.2
= control target key start
LH: loop header
LB: loop body
LE: loop exit
PB: predicated region body
PF: predicated region fallthrough
CT: control target
= control target key end

     0   :  { %v615_v0 = vmov 0.0|0.0   ;;  %v616_v4 = vmov 0.0   ;;  %vm617_vm0 = vmmov 0   ;;  %s872_s2 = inlined_call_operand.vmem [shape: f32[128,128], index: 2, kind: input, shape index: {}]   ;;  %s873_s4 = inlined_call_operand.vmem [shape: f32[128,128], index: 4, kind: input, shape index: {}]   ;;  %s874_s1 = inlined_call_operand.vmem [shape: f32[8,128], index: 1, kind: input, shape index: {}]   ;;  %s875_s6 = inlined_call_operand.vmem [shape: f32[128,128], index: 6, kind: input, shape index: {}]   ;;  %s876_s3 = inlined_call_operand.vmem [shape: f32[1,128], index: 3, kind: input, shape index: {}]   ;;  %s877_s5 = inlined_call_operand.vmem [shape: f32[1,128], index: 5, kind: input, shape index: {}]   ;;  %s878_s0 = inlined_call_operand.<no memory space> [shape: s32[1], index: 0, kind: input, shape index: {}]   ;;  %s879_s7 = inlined_call_operand.vmem [shape: f32[1,128], index: 7, kind: input, shape index: {}]   ;;  %s880_s8 = inlined_call_operand.vmem [shape: f32[8,128], index: 8, kind: output, shape index: {0}]   ;;  %s881_s9 = inlined_call_operand.vmem [shape: f32[2,128], index: 9, kind: output, shape index: {1}]  }
   0x1   :  { %536 = vmatprep.subr.bf16.mxu0 %v615_v0  ;;  %v39_v1 = vld [vmem:[%s872_s2] sm:$0xff]  ;;  %v40_v2 = vld [vmem:[%s872_s2 + $0x8] sm:$0xff]  ;;  %v41_v3 = vld [vmem:[%s872_s2 + $0x10] sm:$0xff]  ;;  %36 = vst [vmem:[#allocation2] sm:$0x1] %v616_v4  ;;  %463 = vmatprep.mubr.msk.f32.mxu0 %vm617_vm0, %v616_v4  ;;  %s354_s26 = scvt.s32.f32 %s878_s0 }
   0x2   :  { %37 = vst [vmem:[#allocation3] sm:$0x1] %v616_v4  ;;  %v537_v5 = vpack.c.bf16 %v40_v2, %v39_v1  ;;  %v42_v6 = vld [vmem:[%s872_s2 + $0x18] sm:$0xff]  ;;  %560 = vmatprep.subr.bf16.mxu1 %v615_v0  ;;  %498 = vmatprep.mubr.msk.f32.mxu1 %vm617_vm0, %v616_v4  ;;  %v43_v8 = vld [vmem:[%s872_s2 + $0x20] sm:$0xff]  ;;  %v44_v9 = vld [vmem:[%s872_s2 + $0x28] sm:$0xff] }
   0x3   :  { %v540_v7 = vpack.c.bf16 %v42_v6, %v41_v3  ;;  %v133_v10 = vld [vmem:[%s873_s4] sm:$0xff]  ;;  %v134_v11 = vld [vmem:[%s873_s4 + $0x8] sm:$0xff]  ;;  %v135_v12 = vld [vmem:[%s873_s4 + $0x10] sm:$0xff]  ;;  %v543_v14 = vpack.c.bf16 %v44_v9, %v43_v8 }
   0x4   :  { %538 = vmatpush3.bf16.msra.mxu0 %v537_v5  ;;  %v136_v13 = vld [vmem:[%s873_s4 + $0x18] sm:$0xff]  ;;  %v561_v15 = vpack.c.bf16 %v134_v11, %v133_v10  ;;  %v45_v16 = vld [vmem:[%s872_s2 + $0x30] sm:$0xff]  ;;  %v137_v19 = vld [vmem:[%s873_s4 + $0x20] sm:$0xff] }
   0x5   :  { %539 = vmatprep.subr.bf16.mxu0 %v615_v0  ;;  %v46_v17 = vld [vmem:[%s872_s2 + $0x38] sm:$0xff]  ;;  %v564_v18 = vpack.c.bf16 %v136_v13, %v135_v12  ;;  %v138_v20 = vld [vmem:[%s873_s4 + $0x28] sm:$0xff]  ;;  %v47_v22 = vld [vmem:[%s872_s2 + $0x40] sm:$0xff] }
   0x6   :  { %562 = vmatpush3.bf16.msra.mxu1 %v561_v15  ;;  %v546_v21 = vpack.c.bf16 %v46_v17, %v45_v16  ;;  %v48_v23 = vld [vmem:[%s872_s2 + $0x48] sm:$0xff]  ;;  %v567_v24 = vpack.c.bf16 %v138_v20, %v137_v19  ;;  %v139_v25 = vld [vmem:[%s873_s4 + $0x30] sm:$0xff]  ;;  %v140_v26 = vld [vmem:[%s873_s4 + $0x38] sm:$0xff] }
   0x7   :  { %563 = vmatprep.subr.bf16.mxu1 %v615_v0  ;;  %v549_v27 = vpack.c.bf16 %v48_v23, %v47_v22  ;;  %v49_v28 = vld [vmem:[%s872_s2 + $0x50] sm:$0xff]  ;;  %v50_v29 = vld [vmem:[%s872_s2 + $0x58] sm:$0xff]  ;;  %v570_v30 = vpack.c.bf16 %v140_v26, %v139_v25  ;;  %v141_v31 = vld [vmem:[%s873_s4 + $0x40] sm:$0xff]  ;;  %v323_v22 = vlaneseq }
   0x8   :  { %541 = vmatpush3.bf16.msra.mxu0 %v540_v7  ;;  %v142_v32 = vld [vmem:[%s873_s4 + $0x48] sm:$0xff]  ;;  %v552_v33 = vpack.c.bf16 %v50_v29, %v49_v28  ;;  %v51_v34 = vld [vmem:[%s872_s2 + $0x60] sm:$0xff]  ;;  %v143_v37 = vld [vmem:[%s873_s4 + $0x50] sm:$0xff] }
   0x9   :  { %542 = vmatprep.subr.bf16.mxu0 %v615_v0  ;;  %v52_v35 = vld [vmem:[%s872_s2 + $0x68] sm:$0xff]  ;;  %v573_v36 = vpack.c.bf16 %v142_v32, %v141_v31  ;;  %v144_v38 = vld [vmem:[%s873_s4 + $0x58] sm:$0xff]  ;;  %v53_v40 = vld [vmem:[%s872_s2 + $0x70] sm:$0xff]  ;;  %v324_v23 = vshrl.u32 %v323_v22, 7 }
   0xa   :  { %565 = vmatpush3.bf16.msra.mxu1 %v564_v18  ;;  %v555_v39 = vpack.c.bf16 %v52_v35, %v51_v34  ;;  %v54_v41 = vld [vmem:[%s872_s2 + $0x78] sm:$0xff]  ;;  %v576_v42 = vpack.c.bf16 %v144_v38, %v143_v37  ;;  %v145_v43 = vld [vmem:[%s873_s4 + $0x60] sm:$0xff]  ;;  %v146_v44 = vld [vmem:[%s873_s4 + $0x68] sm:$0xff] }
   0xb   :  { %566 = vmatprep.subr.bf16.mxu1 %v615_v0  ;;  %v558_v45 = vpack.c.bf16 %v54_v41, %v53_v40  ;;  %v579_v46 = vpack.c.bf16 %v146_v44, %v145_v43  ;;  %v38_v47 = vld [vmem:[%s874_s1] sm:$0xff]  ;;  %v147_v48 = vld [vmem:[%s873_s4 + $0x70] sm:$0xff]  ;;  %v148_v49 = vld [vmem:[%s873_s4 + $0x78] sm:$0xff] }
   0xc   :  { %544 = vmatpush3.bf16.msra.mxu0 %v543_v14  ;;  %v582_v50 = vpack.c.bf16 %v148_v49, %v147_v48  ;;  %v227_v51 = vld [vmem:[%s875_s6] sm:$0xff]  ;;  %v228_v52 = vld [vmem:[%s875_s6 + $0x8] sm:$0xff]  ;;  %v229_v53 = vld [vmem:[%s875_s6 + $0x10] sm:$0xff] }
   0xd   :  { %545 = vmatprep.subr.bf16.mxu0 %v615_v0  ;;  %v585_v54 = vpack.c.bf16 %v228_v52, %v227_v51  ;;  %v230_v55 = vld [vmem:[%s875_s6 + $0x18] sm:$0xff]  ;;  %v231_v57 = vld [vmem:[%s875_s6 + $0x20] sm:$0xff]  ;;  %v232_v58 = vld [vmem:[%s875_s6 + $0x28] sm:$0xff] }
   0xe   :  { %568 = vmatpush3.bf16.msra.mxu1 %v567_v24  ;;  %v588_v56 = vpack.c.bf16 %v230_v55, %v229_v53  ;;  %v591_v59 = vpack.c.bf16 %v232_v58, %v231_v57  ;;  %v233_v60 = vld [vmem:[%s875_s6 + $0x30] sm:$0xff]  ;;  %v234_v61 = vld [vmem:[%s875_s6 + $0x38] sm:$0xff]  ;;  %v235_v63 = vld [vmem:[%s875_s6 + $0x40] sm:$0xff]  ;;  %v327_v24 = vstv %s878_s0 }
   0xf   :  { %569 = vmatprep.subr.bf16.mxu1 %v615_v0  ;;  %v594_v62 = vpack.c.bf16 %v234_v61, %v233_v60  ;;  %v236_v1 = vld [vmem:[%s875_s6 + $0x48] sm:$0xff]  ;;  %v237_v3 = vld [vmem:[%s875_s6 + $0x50] sm:$0xff]  ;;  %v238_v5 = vld [vmem:[%s875_s6 + $0x58] sm:$0xff]  ;;  %vm328_vm1 = vcmp.lt.s32.totalorder %v324_v23, %v327_v24 }
  0x10   :  { %547 = vmatpush3.bf16.msra.mxu0 %v546_v21  ;;  %v597_v2 = vpack.c.bf16 %v236_v1, %v235_v63  ;;  %v600_v6 = vpack.c.bf16 %v238_v5, %v237_v3  ;;  %v239_v7 = vld [vmem:[%s875_s6 + $0x60] sm:$0xff]  ;;  %v240_v8 = vld [vmem:[%s875_s6 + $0x68] sm:$0xff]  ;;  %v241_v15 = vld [vmem:[%s875_s6 + $0x70] sm:$0xff] }
  0x11   :  { %548 = vmatprep.subr.bf16.mxu0 %v615_v0  ;;  %v603_v9 = vpack.c.bf16 %v240_v8, %v239_v7  ;;  %v376_v10 = vld [vmem:[%s876_s3] ss:$0 sm:$0xff]  ;;  %v242_v16 = vld [vmem:[%s875_s6 + $0x78] sm:$0xff]  ;;  %v341_v44 = vld [vmem:[#allocation3] sm:$0x1] }
  0x12   :  { %571 = vmatpush3.bf16.msra.mxu1 %v570_v30  ;;  %v606_v17 = vpack.c.bf16 %v242_v16, %v241_v15  ;;  %v378_v25 = vld [vmem:[%s879_s7] ss:$0 sm:$0xff] }
  0x13   :  { %572 = vmatprep.subr.bf16.mxu1 %v615_v0  ;;  %v332_v41 = vld [vmem:[#allocation2] sm:$0x1] }
  0x14   :  { %550 = vmatpush3.bf16.msra.mxu0 %v549_v27  ;;  %v379_v27 = vsel %vm328_vm1, 1.0, %v616_v4 }
  0x15   :  { %551 = vmatprep.subr.bf16.mxu0 %v615_v0 }
  0x16   :  { %574 = vmatpush3.bf16.msra.mxu1 %v573_v36 }
  0x17   :  { %575 = vmatprep.subr.bf16.mxu1 %v615_v0 }
  0x18   :  { %553 = vmatpush3.bf16.msra.mxu0 %v552_v33 }
  0x19   :  { %554 = vmatprep.subr.bf16.mxu0 %v615_v0 }
  0x1a   :  { %577 = vmatpush3.bf16.msra.mxu1 %v576_v42 }
  0x1b   :  { %578 = vmatprep.subr.bf16.mxu1 %v615_v0 }
  0x1c   :  { %556 = vmatpush3.bf16.msra.mxu0 %v555_v39 }
  0x1d   :  { %557 = vmatprep.subr.bf16.mxu0 %v615_v0 }
  0x1e   :  { %580 = vmatpush3.bf16.msra.mxu1 %v579_v46 }
  0x1f   :  { %581 = vmatprep.subr.bf16.mxu1 %v615_v0 }
  0x20   :  { %559 = vmatpush3.bf16.msra.mxu0 %v558_v45 }
  0x21   :  { %584 = vmatprep.subr.bf16.mxu0 %v615_v0 }
  0x22   :  { %583 = vmatpush3.bf16.msra.mxu1 %v582_v50 }
  0x23   :  { %464 = vmatmul.mubr.f32.vlgmr.msra.gmra.mrb[0].mxu0 %v38_v47 }
  0x24   :  { %533 = vmatprep.mubr.msk.f32.mxu0 %vm617_vm0, %v616_v4  ;;  %586 = vmatpush3.bf16.msra.mxu0 %v585_v54  ;;  %v356_v4 = vstv %s354_s26 }
  0x25   :  { %587 = vmatprep.subr.bf16.mxu0 %v615_v0  ;;  %611 = vrcp.f32 %v356_v4 }
  0x28   :  { %589 = vmatpush3.bf16.msra.mxu0 %v588_v56 }
  0x29   :  { %590 = vmatprep.subr.bf16.mxu0 %v615_v0 }
  0x2c   :  { %592 = vmatpush3.bf16.msra.mxu0 %v591_v59 }
  0x2d   :  { %593 = vmatprep.subr.bf16.mxu0 %v615_v0 }
  0x2f   :  { %v612_v48 = vpop.eup %611 }
  0x30   :  { %595 = vmatpush3.bf16.msra.mxu0 %v594_v62 }
  0x31   :  { %596 = vmatprep.subr.bf16.mxu0 %v615_v0 }
  0x34   :  { %598 = vmatpush3.bf16.msra.mxu0 %v597_v2 }
  0x35   :  { %599 = vmatprep.subr.bf16.mxu0 %v615_v0 }
  0x38   :  { %601 = vmatpush3.bf16.msra.mxu0 %v600_v6 }
  0x39   :  { %602 = vmatprep.subr.bf16.mxu0 %v615_v0 }
  0x3c   :  { %604 = vmatpush3.bf16.msra.mxu0 %v603_v9 }
  0x3d   :  { %605 = vmatprep.subr.bf16.mxu0 %v615_v0  ;;  %v377_v0 = vld [vmem:[%s877_s5] ss:$0 sm:$0xff] }
  0x40   :  { %607 = vmatpush3.bf16.msra.mxu0 %v606_v17 }
  0xf6   :  { %v128_v11 = vpop.f32.mrb[0].mxu0 }
  0xf7   :  { %v129_v12 = vadd.f32 %v376_v10, %v128_v11  ;;  %v465_v13 = vpop.f32.mrb[1].mxu0 }
  0xf9   :  { %v132_v14 = vmax.f32 %v129_v12, 0.0 }
  0xfb   :  { %499 = vmatmul.mubr.f32.vlgmr.msra.gmra.mrb[0].mxu1 %v132_v14 }
 0x1ce   :  { %v222_v18 = vpop.f32.mrb[0].mxu1 }
 0x1cf   :  { %v223_v19 = vadd.f32 %v377_v0, %v222_v18  ;;  %v500_v20 = vpop.f32.mrb[1].mxu1 }
 0x1d1   :  { %v226_v21 = vmax.f32 %v223_v19, 0.0 }
 0x1d3   :  { %534 = vmatmul.mubr.f32.vlgmr.msra.gmra.mrb[2].mxu0 %v226_v21 }
 0x2a6   :  { %v316_v26 = vpop.f32.mrb[2].mxu0 }
 0x2a7   :  { %v317_v28 = vadd.f32 %v378_v25, %v316_v26  ;;  %v535_v29 = vpop.f32.mrb[3].mxu0 }
 0x2a9   :  { %320 = vst [vmem:[%s880_s8] sm:$0xff] %v317_v28  ;;  %v331_v30 = vmul.f32 %v379_v27, %v317_v28 }
 0x2ab   :  { %v333_v31 = vrot.slane %v331_v30, 4  ;;  %v342_v32 = vmul.f32 %v331_v30, %v331_v30 }
 0x2ad   :  { %v334_v33 = vadd.f32 %v333_v31, %v331_v30  ;;  %v343_v34 = vrot.slane %v342_v32, 4 }
 0x2af   :  { %v335_v35 = vrot.slane %v334_v33, 2  ;;  %v344_v36 = vadd.f32 %v343_v34, %v342_v32 }
 0x2b1   :  { %v336_v37 = vadd.f32 %v335_v35, %v334_v33  ;;  %v345_v38 = vrot.slane %v344_v36, 2 }
 0x2b3   :  { %v337_v39 = vrot.slane %v336_v37, 1  ;;  %v346_v40 = vadd.f32 %v345_v38, %v344_v36 }
 0x2b5   :  { %v338_v42 = vadd.f32 %v337_v39, %v336_v37  ;;  %v347_v43 = vrot.slane %v346_v40, 1 }
 0x2b7   :  { %v339_v45 = vadd.f32 %v338_v42, %v332_v41  ;;  %v348_v46 = vadd.f32 %v347_v43, %v346_v40 }
 0x2b9   :  { %340 = vst [vmem:[#allocation2] sm:$0x1] %v339_v45  ;;  %v349_v47 = vadd.f32 %v348_v46, %v341_v44 }
 0x2bb   :  { %350 = vst [vmem:[#allocation3] sm:$0x1] %v349_v47 }
 0x2c0   :  { %v355_v49 = vld [vmem:[#allocation2] sm:$0x1] }
 0x2c1   :  { %v358_v50 = vmul.f32 %v612_v48, %v355_v49 }
 0x2c2   :  { %v359_v51 = vld [vmem:[#allocation3] sm:$0x1] }
 0x2c3   :  { %v360_v52 = vmul.f32 %v612_v48, %v359_v51  ;;  %v361_v53 = vmul.f32 %v358_v50, %v358_v50  ;;  %366 = vst [vmem:[%s881_s9] sm:$0x1] %v358_v50 }
 0x2c5   :  { %v362_v54 = vsub.f32 %v360_v52, %v361_v53 }
 0x2c7   :  { %v363_v55 = vmax.f32 %v362_v54, 0.0 }
 0x2c9   :  { %v364_v56 = vadd.f32 1e-05, %v363_v55 }
 0x2cb   :  { %613 = vrsqrt.f32 %v364_v56 }
 0x2d5   :  { %v614_v57 = vpop.eup %613 }
 0x2d6   :  { %367 = vst [vmem:[%s881_s9 + $0x1] sm:$0x1] %v614_v57 }

// kernel: actor_nn_forward.3
= control target key start
LH: loop header
LB: loop body
LE: loop exit
PB: predicated region body
PF: predicated region fallthrough
CT: control target
= control target key end

     0   :  { %v274_v3 = vmov 0.0|0.0   ;;  %vm275_vm0 = vmmov 0   ;;  %v276_v6 = vmov 0.0   ;;  %s391_s0 = inlined_call_operand.vmem [shape: f32[8,128], index: 0, kind: input, shape index: {}]   ;;  %s392_s1 = inlined_call_operand.vmem [shape: f32[2,128], index: 1, kind: input, shape index: {}]   ;;  %s393_s2 = inlined_call_operand.vmem [shape: f32[1,128], index: 2, kind: input, shape index: {}]   ;;  %s394_s3 = inlined_call_operand.vmem [shape: f32[1,128], index: 3, kind: input, shape index: {}]   ;;  %s395_s4 = inlined_call_operand.vmem [shape: f32[128,128], index: 4, kind: input, shape index: {}]   ;;  %s396_s5 = inlined_call_operand.vmem [shape: f32[1,128], index: 5, kind: input, shape index: {}]   ;;  %s397_s6 = inlined_call_operand.hbm [shape: f32[8,128], index: 6, kind: output, shape index: {}]  }
   0x1   :  { %v54_v0 = vld [vmem:[%s395_s4] sm:$0xff]  ;;  %v55_v1 = vld [vmem:[%s395_s4 + $0x8] sm:$0xff]  ;;  %v56_v2 = vld [vmem:[%s395_s4 + $0x10] sm:$0xff]  ;;  %220 = vmatprep.subr.bf16.mxu0 %v274_v3  ;;  %217 = vmatprep.mubr.msk.f32.mxu0 %vm275_vm0, %v276_v6 }
   0x2   :  { %v221_v4 = vpack.c.bf16 %v55_v1, %v54_v0  ;;  %v57_v5 = vld [vmem:[%s395_s4 + $0x18] sm:$0xff]  ;;  %v58_v8 = vld [vmem:[%s395_s4 + $0x20] sm:$0xff]  ;;  %v59_v9 = vld [vmem:[%s395_s4 + $0x28] sm:$0xff] }
   0x3   :  { %v224_v7 = vpack.c.bf16 %v57_v5, %v56_v2  ;;  %v227_v10 = vpack.c.bf16 %v59_v9, %v58_v8 }
   0x4   :  { %222 = vmatpush3.bf16.msra.mxu0 %v221_v4 }
   0x5   :  { %223 = vmatprep.subr.bf16.mxu0 %v274_v3 }
   0x8   :  { %225 = vmatpush3.bf16.msra.mxu0 %v224_v7 }
   0x9   :  { %11 = vsyncpa [#allocation3], 0  ;;  %226 = vmatprep.subr.bf16.mxu0 %v274_v3  ;;  %v60_v11 = vld [vmem:[%s395_s4 + $0x30] sm:$0xff]  ;;  %v61_v12 = vld [vmem:[%s395_s4 + $0x38] sm:$0xff] }
   0xa   :  { %v230_v13 = vpack.c.bf16 %v61_v12, %v60_v11  ;;  %v24_v14 = vld [vmem:[%s391_s0] sm:$0xff]  ;;  %v63_v17 = vld [vmem:[%s395_s4 + $0x48] sm:$0xff]  ;;  %v64_v21 = vld [vmem:[%s395_s4 + $0x50] sm:$0xff] }
   0xb   :  { %v163_v15 = vld [vmem:[%s392_s1] ss:$0 sm:$0xff]  ;;  %v164_v20 = vld [vmem:[%s392_s1 + $0x1] ss:$0 sm:$0xff]  ;;  %v65_v22 = vld [vmem:[%s395_s4 + $0x58] sm:$0xff] }
   0xc   :  { %228 = vmatpush3.bf16.msra.mxu0 %v227_v10  ;;  %v62_v16 = vld [vmem:[%s395_s4 + $0x40] sm:$0xff]  ;;  %v31_v18 = vsub.f32 %v24_v14, %v163_v15  ;;  %v236_v24 = vpack.c.bf16 %v65_v22, %v64_v21  ;;  %v67_v27 = vld [vmem:[%s395_s4 + $0x68] sm:$0xff]  ;;  %v68_v31 = vld [vmem:[%s395_s4 + $0x70] sm:$0xff] }
   0xd   :  { %229 = vmatprep.subr.bf16.mxu0 %v274_v3  ;;  %v233_v19 = vpack.c.bf16 %v63_v17, %v62_v16  ;;  %v165_v25 = vld [vmem:[%s393_s2] ss:$0 sm:$0xff]  ;;  %v69_v32 = vld [vmem:[%s395_s4 + $0x78] sm:$0xff] }
   0xe   :  { %v36_v23 = vmul.f32 %v164_v20, %v31_v18  ;;  %v66_v26 = vld [vmem:[%s395_s4 + $0x60] sm:$0xff]  ;;  %v242_v34 = vpack.c.bf16 %v69_v32, %v68_v31 }
   0xf   :  { %v239_v29 = vpack.c.bf16 %v67_v27, %v66_v26  ;;  %v166_v30 = vld [vmem:[%s394_s3] ss:$0 sm:$0xff]  ;;  %s277_s3 = smov [#allocation2]  }
  0x10   :  { %231 = vmatpush3.bf16.msra.mxu0 %v230_v13  ;;  %v44_v28 = vmul.f32 %v165_v25, %v36_v23  ;;  %v167_v36 = vld [vmem:[%s396_s5] ss:$0 sm:$0xff]  ;;  %s155_s14 = sshll.u32 %s277_s3, 4  ;;  %s156_s14 = int_to_ptr.vmem [resolvable:$true] %s155_s14 }
  0x11   :  { %232 = vmatprep.subr.bf16.mxu0 %v274_v3  ;;  %s250_s4 = scalar_lea.vmem %s156_s14, 128  ;;  %p255_p1 = scmp.lt.s32.totalorder %s156_s14, %s156_s14 }
  0x12   :  { %v52_v33 = vadd.f32 %v166_v30, %v44_v28  ;;  %p251_p0 = scmp.ne.s32.totalorder %s156_s14, %s250_s4  ;;  %p256_p2 = scmp.lt.s32.totalorder %s250_s4, %s250_s4 }
  0x14   :  { %234 = vmatpush3.bf16.msra.mxu0 %v233_v19  ;;  %v53_v35 = vmax.f32 %v52_v33, 0.0  ;;  %p257_p3 = por %p256_p2, %p255_p1 }
  0x15   :  { %235 = vmatprep.subr.bf16.mxu0 %v274_v3 }
  0x16   :  { %p258_p4 = pnand %p257_p3, %p251_p0 }
  0x18   :  { %237 = vmatpush3.bf16.msra.mxu0 %v236_v24 }
  0x19   :  { %238 = vmatprep.subr.bf16.mxu0 %v274_v3 }
  0x1c   :  { %240 = vmatpush3.bf16.msra.mxu0 %v239_v29 }
  0x1d   :  { %241 = vmatprep.subr.bf16.mxu0 %v274_v3 }
  0x20   :  { %243 = vmatpush3.bf16.msra.mxu0 %v242_v34 }
  0x23   :  { %218 = vmatmul.mubr.f32.vlgmr.msra.gmra.mrb[0].mxu0 %v53_v35 }
  0xf6   :  { %v143_v37 = vpop.f32.mrb[0].mxu0 }
  0xf7   :  { %v144_v38 = vadd.f32 %v167_v36, %v143_v37  ;;  %v219_v39 = vpop.f32.mrb[1].mxu0 }
  0xf9   :  { %248 = vtanh.f32 %v144_v38 }
 0x103   :  { %v249_v40 = vpop.eup %248 }
 0x104   :  { %148 = vst [vmem:[#allocation2] sm:$0xff] %v249_v40 }
 0x105   :  { %261 = shalt.err (!%p258_p4)
}
 0x106   :  { %s262_s5 = scalar_lea.hbm %s397_s6, 128 }
 0x107   :  { %p263_p5 = scmp.ne.s32.totalorder %s397_s6, %s262_s5  ;;  %p266_p6 = scmp.lt.u32.totalorder %s262_s5, %s397_s6 }
 0x109   :  { %p268_p7 = pnand %p266_p6, %p263_p5 }
 0x10b   :  { %271 = shalt.err (!%p268_p7)
}
 0x10c   :  { %158 = dma.vmem_to_hbm [thread:$0]  %s156_s14, 128, %s397_s6, [#allocation3]  }
 0x10d   :  { %272 = dma.done.wait [#allocation3], 128  }
 0x10e   :  { %273 = vsyncadd [#allocation3], 4294967168 }
 0x10f   :  { %162 = vsyncpa [#allocation3], 1 }

</bundles_post_ra>
